<compile_context>
chip_gen: v5e
topology: v5e:2x2
jax: 0.10.0
libtpu: 0.0.40
codegen_flags: <defaults>
</compile_context>

<pallas_src>
import functools

import jax
import jax.numpy as jnp
from jax import lax
from jax.experimental import pallas as pl
from jax.experimental.pallas import tpu as pltpu

BN_EPS = 1e-5


def _round_up(n, m):
    return ((n + m - 1) // m) * m


def _pad_to(a, target_shape):
    pads = [(0, t - s) for s, t in zip(a.shape, target_shape)]
    if all(p == (0, 0) for p in pads):
        return a
    return jnp.pad(a, pads)


def _ffn_kernel(x_ref, w1_ref, b1_ref, gamma_ref, beta_ref, w2_ref, b2_ref,
                bits_ref, out_ref, *, dropout_prob, batch_rows):
    # ---- fc1 on the MXU: bf16 operands, f32 accumulation ----
    x = x_ref[...].astype(jnp.bfloat16)
    w1 = w1_ref[...].astype(jnp.bfloat16)
    h = jnp.dot(x, w1, preferred_element_type=jnp.float32) + b1_ref[...]

    # ---- BatchNorm1d: training-mode batch stats (biased variance), f32 ----
    n_rows = h.shape[0]
    if batch_rows != n_rows:
        # Batch axis was zero-padded: exclude padded rows from the statistics.
        row_ids = lax.broadcasted_iota(jnp.int32, (n_rows, 1), 0)
        valid = (row_ids < batch_rows).astype(jnp.float32)
        inv_n = 1.0 / float(batch_rows)
        mean = jnp.sum(h * valid, axis=0, keepdims=True) * inv_n
        centered = (h - mean) * valid
        var = jnp.sum(centered * centered, axis=0, keepdims=True) * inv_n
    else:
        mean = jnp.mean(h, axis=0, keepdims=True)
        centered = h - mean
        var = jnp.mean(centered * centered, axis=0, keepdims=True)
    h = (h - mean) * lax.rsqrt(var + BN_EPS)
    h = h * gamma_ref[...] + beta_ref[...]

    # ---- ReLU ----
    h = jnp.maximum(h, 0.0)

    # ---- Dropout: integer-threshold compare on precomputed uint32 bits ----
    w2 = w2_ref[...]
    if dropout_prob > 0.0:
        keep_prob = 1.0 - dropout_prob
        threshold = jnp.uint32(min(int(keep_prob * 4294967296.0), 4294967295))
        keep = bits_ref[...] < threshold
        h = jnp.where(keep, h, 0.0)
        # Fold the 1/keep_prob scale into the small (H, Dout) fc2 weight tile
        # instead of a full (B, H)-wide multiply.
        w2 = w2 * (1.0 / keep_prob)

    # ---- fc2 on the MXU: bf16 operands, f32 accumulation ----
    out_ref[...] = (
        jnp.dot(h.astype(jnp.bfloat16), w2.astype(jnp.bfloat16),
                preferred_element_type=jnp.float32) + b2_ref[...]
    ).astype(out_ref.dtype)


def ffn_forward(x, params, dropout_key, *, dropout_prob=0.25):
    """x: (B, 1, input_dim) float32  ->  (B, 1, output_dim) float32."""
    B = x.shape[0]
    din = x.shape[-1]
    x2d = x.reshape(B, din)                                  # .squeeze()

    w1, b1, gamma, beta, w2, b2 = params
    hid = w1.shape[1]
    dout = w2.shape[1]

    # Pad to lane-dense (multiple-of-128 feature dims) / sublane-aligned batch.
    b_pad = _round_up(B, 8)
    din_p = _round_up(din, 128)
    hid_p = _round_up(hid, 128)
    dout_p = _round_up(dout, 128)

    x_p = _pad_to(x2d, (b_pad, din_p))
    w1_p = _pad_to(w1, (din_p, hid_p))
    b1_p = _pad_to(b1, (1, hid_p))
    g_p = _pad_to(gamma, (1, hid_p))
    be_p = _pad_to(beta, (1, hid_p))
    w2_p = _pad_to(w2, (hid_p, dout_p))
    b2_p = _pad_to(b2, (1, dout_p))

    if dropout_prob > 0.0:
        bits = jax.random.bits(dropout_key, (b_pad, hid_p), dtype=jnp.uint32)
    else:
        bits = jnp.zeros((b_pad, hid_p), jnp.uint32)         # never read

    vmem = pl.BlockSpec(memory_space=pltpu.MemorySpace.VMEM)

    out_p = pl.pallas_call(
        functools.partial(_ffn_kernel,
                          dropout_prob=float(dropout_prob),
                          batch_rows=B),
        out_shape=jax.ShapeDtypeStruct((b_pad, dout_p), jnp.float32),
        in_specs=[vmem] * 8,
        out_specs=vmem,
        compiler_params=pltpu.CompilerParams(vmem_limit_bytes=32 * 1024 * 1024),
    )(x_p, w1_p, b1_p, g_p, be_p, w2_p, b2_p, bits)

    return out_p[:B, :dout][:, None, :]                      # .unsqueeze(dim=1)


def init_params(key, input_dim, hidden_dim, output_dim):
    k1, k2, k3, k4 = jax.random.split(key, 4)
    # weights stored transposed: (in, out)
    w1 = jax.random.normal(k1, (input_dim, hidden_dim), jnp.float32) * 0.1
    b1 = jax.random.normal(k2, (1, hidden_dim), jnp.float32) * 0.1
    gamma = jnp.ones((1, hidden_dim), jnp.float32)
    beta = jnp.zeros((1, hidden_dim), jnp.float32)
    w2 = jax.random.normal(k3, (hidden_dim, output_dim), jnp.float32) * 0.1
    b2 = jax.random.normal(k4, (1, output_dim), jnp.float32) * 0.1
    return (w1, b1, gamma, beta, w2, b2)


if __name__ == "__main__":
    B, INPUT_DIM, HIDDEN_DIM, OUTPUT_DIM = 8, 32, 32, 16

    key = jax.random.PRNGKey(0)
    kx, kp, kd = jax.random.split(key, 3)
    x = jax.random.normal(kx, (B, 1, INPUT_DIM), jnp.float32)   # (B, 1, input_dim)
    params = init_params(kp, INPUT_DIM, HIDDEN_DIM, OUTPUT_DIM)

    y = ffn_forward(x, params, kd, dropout_prob=0.25)
    jax.block_until_ready(y)

    assert y.shape == (B, 1, OUTPUT_DIM), y.shape
    assert bool(jnp.all(jnp.isfinite(y)))
    print("KERNEL_OK")
</pallas_src>

<mosaic_0001>
module attributes {stable_mosaic.version = 11 : i64} {
  func.func @_ffn_kernel(%arg0: memref<8x128xf32, #tpu.memory_space<vmem>>, %arg1: memref<128x128xf32, #tpu.memory_space<vmem>>, %arg2: memref<1x128xf32, #tpu.memory_space<vmem>>, %arg3: memref<1x128xf32, #tpu.memory_space<vmem>>, %arg4: memref<1x128xf32, #tpu.memory_space<vmem>>, %arg5: memref<128x128xf32, #tpu.memory_space<vmem>>, %arg6: memref<1x128xf32, #tpu.memory_space<vmem>>, %arg7: memref<8x128xi32, #tpu.memory_space<vmem>>, %arg8: memref<8x128xf32, #tpu.memory_space<vmem>>) attributes {dimension_semantics = [], scalar_prefetch = 0 : i64, scratch_operands = 0 : i64, tpu.core_type = #tpu.core_type<tc>} {
    %c0 = arith.constant 0 : index
    %c0_0 = arith.constant 0 : index
    %0 = vector.load %arg0[%c0, %c0_0] : memref<8x128xf32, #tpu.memory_space<vmem>>, vector<8x128xf32>
    %1 = arith.truncf %0 : vector<8x128xf32> to vector<8x128xbf16>
    %c0_1 = arith.constant 0 : index
    %c0_2 = arith.constant 0 : index
    %2 = vector.load %arg1[%c0_1, %c0_2] : memref<128x128xf32, #tpu.memory_space<vmem>>, vector<128x128xf32>
    %3 = arith.truncf %2 : vector<128x128xf32> to vector<128x128xbf16>
    %cst = arith.constant dense<0.000000e+00> : vector<8x128xf32>
    %4 = tpu.matmul %1, %3, %cst {dimension_numbers = #tpu.dot_dimension_numbers<[1], [0], [0], [1], [0, 0, 1, 1], [], []>} : vector<8x128xbf16>, vector<128x128xbf16>, vector<8x128xf32> -> vector<8x128xf32>
    %c0_3 = arith.constant 0 : index
    %c0_4 = arith.constant 0 : index
    %5 = vector.load %arg2[%c0_3, %c0_4] : memref<1x128xf32, #tpu.memory_space<vmem>>, vector<1x128xf32>
    %6 = vector.broadcast %5 : vector<1x128xf32> to vector<8x128xf32>
    %7 = arith.addf %4, %6 : vector<8x128xf32>
    %cst_5 = arith.constant dense<0.000000e+00> : vector<128xf32>
    %8 = vector.multi_reduction <add>, %7, %cst_5 [0] : vector<8x128xf32> to vector<128xf32>
    %9 = vector.shape_cast %8 : vector<128xf32> to vector<1x128xf32>
    %cst_6 = arith.constant 8.000000e+00 : f32
    %10 = vector.broadcast %cst_6 : f32 to vector<1x128xf32>
    %11 = arith.divf %9, %10 : vector<1x128xf32>
    %12 = vector.broadcast %11 : vector<1x128xf32> to vector<8x128xf32>
    %13 = arith.subf %7, %12 : vector<8x128xf32>
    %14 = arith.mulf %13, %13 : vector<8x128xf32>
    %cst_7 = arith.constant dense<0.000000e+00> : vector<128xf32>
    %15 = vector.multi_reduction <add>, %14, %cst_7 [0] : vector<8x128xf32> to vector<128xf32>
    %16 = vector.shape_cast %15 : vector<128xf32> to vector<1x128xf32>
    %cst_8 = arith.constant 8.000000e+00 : f32
    %17 = vector.broadcast %cst_8 : f32 to vector<1x128xf32>
    %18 = arith.divf %16, %17 : vector<1x128xf32>
    %19 = vector.broadcast %11 : vector<1x128xf32> to vector<8x128xf32>
    %20 = arith.subf %7, %19 : vector<8x128xf32>
    %cst_9 = arith.constant 9.99999974E-6 : f32
    %21 = vector.broadcast %cst_9 : f32 to vector<1x128xf32>
    %22 = arith.addf %18, %21 : vector<1x128xf32>
    %23 = math.rsqrt %22 : vector<1x128xf32>
    %24 = vector.broadcast %23 : vector<1x128xf32> to vector<8x128xf32>
    %25 = arith.mulf %20, %24 : vector<8x128xf32>
    %c0_10 = arith.constant 0 : index
    %c0_11 = arith.constant 0 : index
    %26 = vector.load %arg3[%c0_10, %c0_11] : memref<1x128xf32, #tpu.memory_space<vmem>>, vector<1x128xf32>
    %27 = vector.broadcast %26 : vector<1x128xf32> to vector<8x128xf32>
    %28 = arith.mulf %25, %27 : vector<8x128xf32>
    %c0_12 = arith.constant 0 : index
    %c0_13 = arith.constant 0 : index
    %29 = vector.load %arg4[%c0_12, %c0_13] : memref<1x128xf32, #tpu.memory_space<vmem>>, vector<1x128xf32>
    %30 = vector.broadcast %29 : vector<1x128xf32> to vector<8x128xf32>
    %31 = arith.addf %28, %30 : vector<8x128xf32>
    %cst_14 = arith.constant 0.000000e+00 : f32
    %32 = vector.broadcast %cst_14 : f32 to vector<8x128xf32>
    %33 = arith.maximumf %31, %32 : vector<8x128xf32>
    %c0_15 = arith.constant 0 : index
    %c0_16 = arith.constant 0 : index
    %34 = vector.load %arg5[%c0_15, %c0_16] : memref<128x128xf32, #tpu.memory_space<vmem>>, vector<128x128xf32>
    %c0_17 = arith.constant 0 : index
    %c0_18 = arith.constant 0 : index
    %35 = vector.load %arg7[%c0_17, %c0_18] : memref<8x128xi32, #tpu.memory_space<vmem>>, vector<8x128xi32>
    %c-1073741824_i32 = arith.constant -1073741824 : i32
    %36 = vector.broadcast %c-1073741824_i32 : i32 to vector<8x128xi32>
    %37 = arith.cmpi ult, %35, %36 : vector<8x128xi32>
    %cst_19 = arith.constant 0.000000e+00 : f32
    %38 = vector.broadcast %cst_19 : f32 to vector<8x128xf32>
    %39 = arith.select %37, %33, %38 : vector<8x128xi1>, vector<8x128xf32>
    %cst_20 = arith.constant 1.33333337 : f32
    %40 = vector.broadcast %cst_20 : f32 to vector<128x128xf32>
    %41 = arith.mulf %34, %40 : vector<128x128xf32>
    %42 = arith.truncf %39 : vector<8x128xf32> to vector<8x128xbf16>
    %43 = arith.truncf %41 : vector<128x128xf32> to vector<128x128xbf16>
    %cst_21 = arith.constant dense<0.000000e+00> : vector<8x128xf32>
    %44 = tpu.matmul %42, %43, %cst_21 {dimension_numbers = #tpu.dot_dimension_numbers<[1], [0], [0], [1], [0, 0, 1, 1], [], []>} : vector<8x128xbf16>, vector<128x128xbf16>, vector<8x128xf32> -> vector<8x128xf32>
    %c0_22 = arith.constant 0 : index
    %c0_23 = arith.constant 0 : index
    %45 = vector.load %arg6[%c0_22, %c0_23] : memref<1x128xf32, #tpu.memory_space<vmem>>, vector<1x128xf32>
    %46 = vector.broadcast %45 : vector<1x128xf32> to vector<8x128xf32>
    %47 = arith.addf %44, %46 : vector<8x128xf32>
    %c0_24 = arith.constant 0 : index
    %c0_25 = arith.constant 0 : index
    %48 = vector.load %arg8[%c0_24, %c0_25] : memref<8x128xf32, #tpu.memory_space<vmem>>, vector<8x128xf32>
    tpu.vector_store %arg8[%c0_24, %c0_25], %47 {strides = array<i32>} : memref<8x128xf32, #tpu.memory_space<vmem>>, vector<8x128xf32>,
    return
  }
}

</mosaic_0001>

<bundles_post_ra>
// kernel: tpu_custom_call.1
= control target key start
LH: loop header
LB: loop body
LE: loop exit
PB: predicated region body
PF: predicated region fallthrough
CT: control target
= control target key end

     0   :  { %13 = vsyncpa [#allocation3], 0  ;;  %s489_s0 = inlined_call_operand.hbm [shape: f32[8,128], index: 0, kind: input, shape index: {}]   ;;  %s490_s1 = inlined_call_operand.hbm [shape: f32[128,128], index: 1, kind: input, shape index: {}]   ;;  %s491_s2 = inlined_call_operand.vmem [shape: f32[1,128], index: 2, kind: input, shape index: {}]   ;;  %s492_s3 = inlined_call_operand.vmem [shape: f32[1,128], index: 3, kind: input, shape index: {}]   ;;  %s493_s4 = inlined_call_operand.vmem [shape: f32[1,128], index: 4, kind: input, shape index: {}]   ;;  %s494_s5 = inlined_call_operand.hbm [shape: f32[128,128], index: 5, kind: input, shape index: {}]   ;;  %s495_s6 = inlined_call_operand.vmem [shape: f32[1,128], index: 6, kind: input, shape index: {}]   ;;  %s496_s7 = inlined_call_operand.hbm [shape: u32[8,128], index: 7, kind: input, shape index: {}]   ;;  %s497_s8 = inlined_call_operand.hbm [shape: f32[8,128], index: 8, kind: output, shape index: {}]  }
   0x1   :  { %14 = vsyncpa [#allocation6], 0 }
   0x2   :  { %15 = vsyncpa [#allocation9], 0  ;;  %s32_s29 = sshll.u32 %s490_s1, 4  ;;  %s33_s29 = int_to_ptr.hbm [resolvable:$true] %s32_s29 }
   0x3   :  { %16 = vsyncpa [#allocation4], 0  ;;  %s409_s30 = smov [#allocation5]   ;;  %s22_s12 = sshll.u32 %s489_s0, 4  ;;  %s23_s12 = int_to_ptr.hbm [resolvable:$true] %s22_s12 }
   0x4   :  { %s34_s9 = sshll.u32 %s409_s30, 4  ;;  %s410_s13 = smov 128   ;;  %s35_s9 = int_to_ptr.vmem [resolvable:$true] %s34_s9 }
   0x5   :  { %s411_s14 = smov 8   ;;  %s412_s15 = smov [#allocation2]  }
   0x6   :  { %40 = dma.hbm_to_vmem [thread:$0]  %s33_s29, 2048, %s35_s9, [#allocation6], %s410_s13, %s410_s13, %s411_s14  }
   0x7   :  { %s24_s16 = sshll.u32 %s412_s15, 4  ;;  %s51_s19 = sshll.u32 %s494_s5, 4  ;;  %s25_s16 = int_to_ptr.vmem [resolvable:$true] %s24_s16  ;;  %s52_s19 = int_to_ptr.hbm [resolvable:$true] %s51_s19 }
   0x8   :  { %27 = dma.hbm_to_vmem [thread:$0]  %s23_s12, 128, %s25_s16, [#allocation3]  }
   0x9   :  { %s67_s21 = sshll.u32 %s496_s7, 4  ;;  %s413_s22 = smov [#allocation7]   ;;  %s68_s21 = int_to_ptr.hbm [resolvable:$true] %s67_s21 }
   0xa   :  { %s53_s23 = sshll.u32 %s413_s22, 4  ;;  %s414_s0 = smov [#allocation8]   ;;  %s54_s23 = int_to_ptr.vmem [resolvable:$true] %s53_s23 }
   0xb   :  { %59 = dma.hbm_to_vmem [thread:$0]  %s52_s19, 2048, %s54_s23, [#allocation6], %s410_s13, %s410_s13, %s411_s14  }
   0xc   :  { %s69_s24 = sshll.u32 %s414_s0, 4  ;;  %s70_s24 = int_to_ptr.vmem [resolvable:$true] %s69_s24 }
   0xd   :  { %72 = dma.hbm_to_vmem [thread:$0]  %s68_s21, 128, %s70_s24, [#allocation9]  }
   0xe   :  { %401 = dma.done.wait [#allocation3], 128  }
   0xf   :  { %402 = vsyncadd [#allocation3], 4294967168 }
  0x10   :  { %403 = dma.done.wait [#allocation6], 4096  }
  0x11   :  { %404 = vsyncadd [#allocation6], 4294963200 }
  0x12   :  { %405 = dma.done.wait [#allocation9], 128  }
  0x13   :  { %406 = vsyncadd [#allocation9], 4294967168  ;;  %v105_v0 = vld [vmem:[#allocation5 + $0x70] sm:$0xff]  ;;  %v106_v1 = vld [vmem:[#allocation5 + $0x78] sm:$0xff]  ;;  %v415_v26 = vmov 8.0   ;;  %s416_s30 = smov [#allocation10]  }
  0x14   :  { %v103_v2 = vld [vmem:[#allocation5 + $0x60] sm:$0xff]  ;;  %v114_v3 = vpack.c.bf16 %v106_v1, %v105_v0  ;;  %v104_v4 = vld [vmem:[#allocation5 + $0x68] sm:$0xff]  ;;  %v101_v6 = vld [vmem:[#allocation5 + $0x50] sm:$0xff]  ;;  %277 = vrcp.f32 %v415_v26  ;;  %s249_s11 = sshll.u32 %s497_s8, 4  ;;  %s250_s11 = int_to_ptr.hbm [resolvable:$true] %s249_s11 }
  0x15   :  { %v113_v5 = vpack.c.bf16 %v104_v4, %v103_v2  ;;  %v102_v7 = vld [vmem:[#allocation5 + $0x58] sm:$0xff]  ;;  %v99_v9 = vld [vmem:[#allocation5 + $0x40] sm:$0xff]  ;;  %v100_v10 = vld [vmem:[#allocation5 + $0x48] sm:$0xff] }
  0x16   :  { %119 = vmatpush.bf16.msra.mxu0 %v114_v3  ;;  %v112_v8 = vpack.c.bf16 %v102_v7, %v101_v6  ;;  %v111_v11 = vpack.c.bf16 %v100_v10, %v99_v9  ;;  %v97_v12 = vld [vmem:[#allocation5 + $0x30] sm:$0xff]  ;;  %v98_v13 = vld [vmem:[#allocation5 + $0x38] sm:$0xff]  ;;  %v95_v15 = vld [vmem:[#allocation5 + $0x20] sm:$0xff] }
  0x17   :  { %v110_v14 = vpack.c.bf16 %v98_v13, %v97_v12  ;;  %v96_v16 = vld [vmem:[#allocation5 + $0x28] sm:$0xff]  ;;  %v93_v18 = vld [vmem:[#allocation5 + $0x10] sm:$0xff]  ;;  %v94_v19 = vld [vmem:[#allocation5 + $0x18] sm:$0xff] }
  0x18   :  { %v109_v17 = vpack.c.bf16 %v96_v16, %v95_v15  ;;  %v108_v20 = vpack.c.bf16 %v94_v19, %v93_v18  ;;  %v91_v21 = vld [vmem:[#allocation5] sm:$0xff]  ;;  %v92_v22 = vld [vmem:[#allocation5 + $0x8] sm:$0xff]  ;;  %v89_v24 = vld [vmem:[#allocation2] sm:$0xff] }
  0x19   :  { %v107_v23 = vpack.c.bf16 %v92_v22, %v91_v21  ;;  %v90_v25 = vpack.c.bf16 %v89_v24, %v89_v24  ;;  %v273_v29 = vld [vmem:[%s491_s2] ss:$0 sm:$0xff]  ;;  %v192_v30 = vld [vmem:[#allocation7 + $0x70] sm:$0xff]  ;;  %v190_v38 = vld [vmem:[#allocation7 + $0x60] sm:$0xff] }
  0x1a   :  { %120 = vmatpush.bf16.msra.mxu0 %v113_v5  ;;  %v278_v27 = vpop.eup %277  ;;  %v193_v31 = vld [vmem:[#allocation7 + $0x78] sm:$0xff]  ;;  %v213_v32 = vmul.f32 1.3333334, %v192_v30  ;;  %v191_v39 = vld [vmem:[#allocation7 + $0x68] sm:$0xff]  ;;  %v211_v40 = vmul.f32 1.3333334, %v190_v38 }
  0x1b   :  { %v139_v28 = vmul.f32 8.0, %v278_v27  ;;  %v214_v33 = vmul.f32 1.3333334, %v193_v31  ;;  %v212_v41 = vmul.f32 1.3333334, %v191_v39  ;;  %v188_v46 = vld [vmem:[#allocation7 + $0x50] sm:$0xff]  ;;  %vm143_vm0 = vweird.f32 %v278_v27 }
  0x1c   :  { %v189_v47 = vld [vmem:[#allocation7 + $0x58] sm:$0xff]  ;;  %v209_v48 = vmul.f32 1.3333334, %v188_v46  ;;  %v186_v55 = vld [vmem:[#allocation7 + $0x40] sm:$0xff]  ;;  %v187_v56 = vld [vmem:[#allocation7 + $0x48] sm:$0xff] }
  0x1d   :  { %v140_v35 = vsub.f32 1.0, %v139_v28  ;;  %v223_v36 = vpack.c.bf16 %v214_v33, %v213_v32  ;;  %v222_v44 = vpack.c.bf16 %v212_v41, %v211_v40  ;;  %v210_v49 = vmul.f32 1.3333334, %v189_v47  ;;  %v184_v63 = vld [vmem:[#allocation7 + $0x30] sm:$0xff]  ;;  %v185_v0 = vld [vmem:[#allocation7 + $0x38] sm:$0xff]  ;;  %v182_v6 = vld [vmem:[#allocation7 + $0x20] sm:$0xff] }
  0x1e   :  { %121 = vmatpush.bf16.msra.mxu0 %v112_v8  ;;  %v207_v57 = vmul.f32 1.3333334, %v186_v55  ;;  %v208_v58 = vmul.f32 1.3333334, %v187_v56  ;;  %v205_v1 = vmul.f32 1.3333334, %v184_v63 }
  0x1f   :  { %228 = vmatpush.bf16.msra.mxu1 %v223_v36  ;;  %v141_v43 = vmul.f32 %v278_v27, %v140_v35  ;;  %v221_v53 = vpack.c.bf16 %v210_v49, %v209_v48  ;;  %v206_v2 = vmul.f32 1.3333334, %v185_v0  ;;  %v183_v7 = vld [vmem:[#allocation7 + $0x28] sm:$0xff]  ;;  %v203_v8 = vmul.f32 1.3333334, %v182_v6  ;;  %v180_v13 = vld [vmem:[#allocation7 + $0x10] sm:$0xff] }
  0x20   :  { %v220_v61 = vpack.c.bf16 %v208_v58, %v207_v57  ;;  %v204_v9 = vmul.f32 1.3333334, %v183_v7  ;;  %v201_v15 = vmul.f32 1.3333334, %v180_v13  ;;  %v178_v18 = vld [vmem:[#allocation7] sm:$0xff]  ;;  %v179_v19 = vld [vmem:[#allocation7 + $0x8] sm:$0xff] }
  0x21   :  { %v142_v51 = vadd.f32 %v278_v27, %v141_v43  ;;  %v219_v4 = vpack.c.bf16 %v206_v2, %v205_v1  ;;  %v199_v21 = vmul.f32 1.3333334, %v178_v18  ;;  %v200_v22 = vmul.f32 1.3333334, %v179_v19  ;;  %v194_v36 = vld [vmem:[#allocation8] sm:$0xff] }
  0x22   :  { %122 = vmatpush.bf16.msra.mxu0 %v111_v11  ;;  %v218_v11 = vpack.c.bf16 %v204_v9, %v203_v8  ;;  %v275_v40 = vld [vmem:[%s493_s4] ss:$0 sm:$0xff]  ;;  %v261_v41 = vxor.u32 2147483648, %v194_v36 }
  0x23   :  { %229 = vmatpush.bf16.msra.mxu1 %v222_v44  ;;  %v144_v60 = vsel %vm143_vm0, %v278_v27, %v142_v51  ;;  %v216_v24 = vpack.c.bf16 %v200_v22, %v199_v21  ;;  %v276_v46 = vld [vmem:[%s495_s6] ss:$0 sm:$0xff] }
  0x24   :  { %vm197_vm4 = vcmp.lt.s32.totalorder %v261_v41, 1073741824 }
  0x25   :  { %vm262_vm5 = vmpackc.low %vm197_vm4, %vm197_vm4 }
  0x26   :  { %123 = vmatpush.bf16.msra.mxu0 %v110_v14  ;;  %v181_v14 = vld [vmem:[#allocation7 + $0x18] sm:$0xff] }
  0x27   :  { %230 = vmatpush.bf16.msra.mxu1 %v221_v53  ;;  %v202_v16 = vmul.f32 1.3333334, %v181_v14 }
  0x2a   :  { %124 = vmatpush.bf16.msra.mxu0 %v109_v17 }
  0x2b   :  { %231 = vmatpush.bf16.msra.mxu1 %v220_v61 }
  0x2e   :  { %125 = vmatpush.bf16.msra.mxu0 %v108_v20  ;;  %v217_v20 = vpack.c.bf16 %v202_v16, %v201_v15 }
  0x2f   :  { %232 = vmatpush.bf16.msra.mxu1 %v219_v4 }
  0x32   :  { %126 = vmatpush.bf16.msra.mxu0 %v107_v23 }
  0x33   :  { %233 = vmatpush.bf16.msra.mxu1 %v218_v11 }
  0x35   :  { %127 = vmatmul.bf16.vlgmr.msra.gmra.mxu0 %v90_v25 }
  0x37   :  { %234 = vmatpush.bf16.msra.mxu1 %v217_v20 }
  0x3b   :  { %235 = vmatpush.bf16.msra.mxu1 %v216_v24 }
  0xb2   :  { %v128_v34 = vpop.f32.mrf.mxu0 }
  0xb3   :  { %v129_v37 = vadd.f32 %v273_v29, %v128_v34 }
  0xb5   :  { %v132_v42 = vrot.slane %v129_v37, 4 }
  0xb7   :  { %v133_v45 = vadd.f32 %v132_v42, %v129_v37 }
  0xb9   :  { %v134_v50 = vrot.slane %v133_v45, 2 }
  0xba   :  { %v130_v52 = vpop.f32.mrf.mxu0 }
  0xbb   :  { %v135_v54 = vadd.f32 %v134_v50, %v133_v45 }
  0xbd   :  { %v136_v59 = vrot.slane %v135_v54, 1 }
  0xbf   :  { %v137_v62 = vadd.f32 %v136_v59, %v135_v54 }
  0xc1   :  { %v145_v3 = vmul.f32 %v144_v60, %v137_v62 }
  0xc3   :  { %v146_v5 = vsub.f32 %v129_v37, %v145_v3  ;;  %v274_v37 = vld [vmem:[%s492_s3] ss:$0 sm:$0xff]  ;;  %s247_s3 = sshll.u32 %s416_s30, 4  ;;  %s248_s3 = int_to_ptr.vmem [resolvable:$true] %s247_s3 }
  0xc5   :  { %v147_v10 = vmul.f32 %v146_v5, %v146_v5 }
  0xc7   :  { %v148_v12 = vrot.slane %v147_v10, 4 }
  0xc9   :  { %v149_v17 = vadd.f32 %v148_v12, %v147_v10 }
  0xcb   :  { %v150_v23 = vrot.slane %v149_v17, 2 }
  0xcd   :  { %v151_v25 = vadd.f32 %v150_v23, %v149_v17 }
  0xcf   :  { %v152_v26 = vrot.slane %v151_v25, 1 }
  0xd1   :  { %v153_v27 = vadd.f32 %v152_v26, %v151_v25 }
  0xd3   :  { %v154_v28 = vmul.f32 %v153_v27, %v144_v60 }
  0xd5   :  { %v155_v29 = vadd.f32 1e-05, %v154_v28 }
  0xd7   :  { %279 = vrsqrt.f32 %v155_v29  ;;  %vm162_vm2 = vweird.f32 %v155_v29 }
  0xdd   :  { %v280_v30 = vpop.eup %279 }
  0xde   :  { %v157_v31 = vmul.f32 %v280_v30, %v155_v29  ;;  %vm163_vm1 = vweird.f32 %v280_v30 }
  0xdf   :  { %vm164_vm3 = vmor %vm162_vm2, %vm163_vm1 }
  0xe0   :  { %v158_v32 = vmul.f32 %v280_v30, %v157_v31 }
  0xe2   :  { %v159_v33 = vmul.f32 0.5, %v158_v32 }
  0xe4   :  { %v160_v34 = vsub.f32 1.5, %v159_v33 }
  0xe6   :  { %v161_v35 = vmul.f32 %v280_v30, %v160_v34 }
  0xe8   :  { %v165_v38 = vsel %vm164_vm3, %v280_v30, %v161_v35 }
  0xe9   :  { %v166_v39 = vmul.f32 %v165_v38, %v146_v5 }
  0xeb   :  { %v171_v42 = vmul.f32 %v274_v37, %v166_v39 }
  0xed   :  { %v176_v43 = vadd.f32 %v275_v40, %v171_v42 }
  0xef   :  { %v177_v44 = vmax.f32 %v176_v43, 0.0 }
  0xf1   :  { %v263_v45 = vpack.c.bf16 %v177_v44, %v177_v44 }
  0xf3   :  { %264 = vmatmul.msk.bf16.vlgmr.msra.gmra.mxu1 %vm262_vm5, %v263_v45 }
 0x170   :  { %v237_v47 = vpop.f32.mrf.mxu1 }
 0x171   :  { %v238_v48 = vadd.f32 %v276_v46, %v237_v47 }
 0x173   :  { %241 = vst [vmem:[#allocation10] sm:$0xff] %v238_v48 }
 0x174   :  { %252 = dma.vmem_to_hbm [thread:$0]  %s248_s3, 128, %s250_s11, [#allocation4]  }
 0x178   :  { %v239_v49 = vpop.f32.mrf.mxu1 }
 0x179   :  { %407 = dma.done.wait [#allocation4], 128  }
 0x17a   :  { %408 = vsyncadd [#allocation4], 4294967168 }
 0x17b   :  { %257 = vsyncpa [#allocation3], 1 }
 0x17c   :  { %258 = vsyncpa [#allocation6], 1 }
 0x17d   :  { %259 = vsyncpa [#allocation9], 1 }
 0x17e   :  { %260 = vsyncpa [#allocation4], 1 }

</bundles_post_ra>
